<compile_context>
chip_gen: v5e
topology: v5e:2x2
jax: 0.10.0
libtpu: 0.0.40
codegen_flags: <defaults>
</compile_context>

<pallas_src>
import functools

import jax
import jax.numpy as jnp
from jax import lax
from jax.experimental import pallas as pl
from jax.experimental.pallas import tpu as pltpu


# ---------------------------------------------------------------------------
# hardware / tile-size selection helpers
# ---------------------------------------------------------------------------
_C_TILE_CAP = 256          # per perf review: grow c_tile up to 128-256


def _hw_params():
    """(vmem_limit_bytes, block_elems_target).

    Block budgets are in *elements* (f32-equivalent working set: statistics
    and the affine run in f32 vregs), so a 1M-element block is ~4 MiB of f32
    or ~2 MiB of bf16 HBM traffic -- both inside the measured >=85%-of-HBM-
    roofline regime (1-4 MiB blocks)."""
    vmem_limit = 32 << 20          # safe on every generation (v7x VMEM = 64 MiB)
    try:                           # v5e / v6e have 128 MiB VMEM -> more headroom
        if int(pltpu.get_tpu_info().vmem_capacity_bytes) >= (128 << 20):
            vmem_limit = 64 << 20
    except Exception:
        pass
    return vmem_limit, 1 << 20     # ~1M elements per streamed x block


def _sublane_unit(itemsize):
    # 8 rows for f32, 16 for bf16, 32 for int8 -> packed-sublane friendly tiles.
    return max(8, 32 // int(itemsize))


def _divisor_tiles(dim, unit):
    """Divisors of `dim` that are multiples of `unit`, plus `dim` itself
    (a full-extent block always satisfies the (8,128) rule), descending."""
    cands = {dim}
    for t in range(unit, dim, unit):
        if dim % t == 0:
            cands.add(t)
    return sorted(cands, reverse=True)


def _pick_fused_c_tile(N, C, M, itemsize, fused_elems):
    """Channel tile for the single-pass (VMEM-resident) conv path, or None."""
    cands = _divisor_tiles(C, _sublane_unit(itemsize))
    slab = N * M
    fitting = [c for c in cands if c * slab <= fused_elems]
    if not fitting:
        return None
    for c in fitting:                 # largest tile that still leaves >=2 blocks
        if C // c >= 2:               # on the megacore-parallel axis (v7x)
            return c
    return fitting[0]


def _pick_fused_f_tile(N, F, itemsize, fused_elems):
    """Feature tile for the single-pass (VMEM-resident) fc path, or None."""
    del itemsize
    cands = _divisor_tiles(F, 128)
    fitting = [f for f in cands if N * f <= fused_elems]
    if not fitting:
        return None
    for f in fitting:
        if F // f >= 2:
            return f
    return fitting[0]


def _pick_tiles_cm(N, C, M, itemsize, block_elems):
    """(c_tile, m_tile, nsplit) for the streaming two-pass conv path."""
    c_cands = _divisor_tiles(C, _sublane_unit(itemsize))
    c_tile = m_tile = None
    for c in c_cands:                 # prefer fully-contiguous rows (m_tile == M)
        if c <= _C_TILE_CAP and c * M <= block_elems:
            c_tile, m_tile = c, M
            break
    if c_tile is None:                # rows too long -> tile M as well
        c_tile = c_cands[-1]
        m_cands = _divisor_tiles(M, 128)
        m_tile = next((m for m in m_cands if c_tile * m <= block_elems),
                      m_cands[-1])
    # v7x megacore: ensure >=2 blocks on a parallel axis of the stats pass even
    # when all channels fit in one tile, by splitting the batch into two
    # partial-sum accumulators (summed in the JAX epilogue).
    nsplit = 2 if (C // c_tile == 1 and N % 2 == 0 and N >= 2) else 1
    return c_tile, m_tile, nsplit


def _pick_tiles_nf(N, F, itemsize, block_elems):
    """(n_tile, f_tile, nsplit) for the streaming two-pass fc path."""
    sub = _sublane_unit(itemsize)
    f_tile = F                        # prefer fully-contiguous rows
    if F * sub > block_elems:
        f_cands = _divisor_tiles(F, 128)
        f_tile = next((f for f in f_cands if f * sub <= block_elems),
                      f_cands[-1])
    nsplit = 2 if (F // f_tile == 1 and N % (2 * sub) == 0) else 1
    n_cands = _divisor_tiles(N // nsplit, sub)
    n_tile = next((n for n in n_cands if n * f_tile <= block_elems),
                  n_cands[-1])
    return n_tile, f_tile, nsplit


# ---------------------------------------------------------------------------
# kernels -- conv path (NCHW viewed as (N, C, M=H*W); C sublanes, M lanes)
# ---------------------------------------------------------------------------
def _fused_kernel_cm(x_ref, gamma_ref, beta_ref, y_ref, mean_ref, var_ref, *,
                     inv_count, eps):
    """Single pass: the (N, c_tile, M) slab is VMEM-resident; compute the
    per-channel statistics and apply the affine in the same kernel."""
    x = x_ref[...].astype(jnp.float32)                            # (N, c_tile, M)
    s = jnp.sum(jnp.sum(x, axis=0), axis=-1, keepdims=True)        # (c_tile, 1)
    s2 = jnp.sum(jnp.sum(x * x, axis=0), axis=-1, keepdims=True)
    mean = s * inv_count
    # E[x^2]-E[x]^2 in f32; clamp fp-noise negatives.
    # TODO(synk): switch to a shifted / Welford accumulation if offset-heavy
    # (|mean| >> std) inputs ever show up.
    var = jnp.maximum(s2 * inv_count - mean * mean, 0.0)
    scale = gamma_ref[...] * lax.rsqrt(var + eps)                   # (c_tile, 1)
    shift = beta_ref[...] - mean * scale
    y_ref[...] = (x * scale + shift).astype(y_ref.dtype)
    mean_ref[...] = mean
    var_ref[...] = var


def _stats_kernel_cm(x_ref, sum_ref, sumsq_ref):
    """Pass 1 (streaming): accumulate per-channel sum / sum-of-squares.
    grid = (nsplit, nc, N//nsplit, nm); reduction axes are the trailing two."""
    @pl.when((pl.program_id(2) == 0) & (pl.program_id(3) == 0))
    def _():
        sum_ref[...] = jnp.zeros_like(sum_ref)
        sumsq_ref[...] = jnp.zeros_like(sumsq_ref)

    x = x_ref[...].astype(jnp.float32)                             # (c_tile, m_tile)
    sum_ref[...] += jnp.sum(x, axis=-1, keepdims=True)             # (c_tile, 1)
    sumsq_ref[...] += jnp.sum(x * x, axis=-1, keepdims=True)


def _apply_kernel_cm(x_ref, sum_ref, sumsq_ref, gamma_ref, beta_ref, y_ref, *,
                     inv_count, eps):
    """Pass 2 (streaming): y = x*scale + shift, with scale/shift derived
    in-kernel from the per-channel sums (the old XLA glue epilogue).  The
    extra per-step work is O(c_tile) on VALU/EUP, hidden under the HBM stream."""
    mean = sum_ref[...] * inv_count                                # (c_tile, 1)
    var = jnp.maximum(sumsq_ref[...] * inv_count - mean * mean, 0.0)
    scale = gamma_ref[...] * lax.rsqrt(var + eps)
    shift = beta_ref[...] - mean * scale
    x = x_ref[...].astype(jnp.float32)                             # (c_tile, m_tile)
    y_ref[...] = (x * scale + shift).astype(y_ref.dtype)


# ---------------------------------------------------------------------------
# kernels -- fc path ((N, F); F on lanes -> lane-dense per-feature stats)
# ---------------------------------------------------------------------------
def _fused_kernel_nf(x_ref, gamma_ref, beta_ref, y_ref, mean_ref, var_ref, *,
                     inv_count, eps):
    x = x_ref[...].astype(jnp.float32)                             # (N, f_tile)
    s = jnp.sum(x, axis=0, keepdims=True)                          # (1, f_tile)
    s2 = jnp.sum(x * x, axis=0, keepdims=True)
    mean = s * inv_count
    var = jnp.maximum(s2 * inv_count - mean * mean, 0.0)
    scale = gamma_ref[...] * lax.rsqrt(var + eps)
    shift = beta_ref[...] - mean * scale
    y_ref[...] = (x * scale + shift).astype(y_ref.dtype)
    mean_ref[...] = mean
    var_ref[...] = var


def _stats_kernel_nf(x_ref, sum_ref, sumsq_ref):
    """grid = (nsplit, nf, nn); the batch-tile axis (last) is the reduction."""
    @pl.when(pl.program_id(2) == 0)
    def _():
        sum_ref[...] = jnp.zeros_like(sum_ref)
        sumsq_ref[...] = jnp.zeros_like(sumsq_ref)

    x = x_ref[...].astype(jnp.float32)                             # (n_tile, f_tile)
    sum_ref[...] += jnp.sum(x, axis=-2, keepdims=True)             # (1, f_tile)
    sumsq_ref[...] += jnp.sum(x * x, axis=-2, keepdims=True)


def _apply_kernel_nf(x_ref, sum_ref, sumsq_ref, gamma_ref, beta_ref, y_ref, *,
                     inv_count, eps):
    mean = sum_ref[...] * inv_count                                # (1, f_tile)
    var = jnp.maximum(sumsq_ref[...] * inv_count - mean * mean, 0.0)
    scale = gamma_ref[...] * lax.rsqrt(var + eps)
    shift = beta_ref[...] - mean * scale
    y_ref[...] = (x_ref[...].astype(jnp.float32) * scale + shift).astype(y_ref.dtype)


# ---------------------------------------------------------------------------
# pallas_call wrappers -- conv path
# ---------------------------------------------------------------------------
def _bn_fused_ncm(x3, gamma_c, beta_c, c_tile, inv_count, eps, vmem_limit):
    N, C, M = x3.shape
    nc = C // c_tile
    kern = functools.partial(_fused_kernel_cm, inv_count=inv_count, eps=eps)
    chan = pl.BlockSpec((c_tile, 1), lambda c: (c, 0))
    return pl.pallas_call(
        kern,
        out_shape=(jax.ShapeDtypeStruct((N, C, M), x3.dtype),
                   jax.ShapeDtypeStruct((C, 1), jnp.float32),
                   jax.ShapeDtypeStruct((C, 1), jnp.float32)),
        grid=(nc,),
        in_specs=[pl.BlockSpec((N, c_tile, M), lambda c: (0, c, 0)), chan, chan],
        out_specs=(pl.BlockSpec((N, c_tile, M), lambda c: (0, c, 0)), chan, chan),
        compiler_params=pltpu.CompilerParams(
            dimension_semantics=("parallel",), vmem_limit_bytes=vmem_limit),
    )(x3, gamma_c, beta_c)


def _bn_stats_ncm(x3, c_tile, m_tile, nsplit, vmem_limit):
    N, C, M = x3.shape
    nc, nm = C // c_tile, M // m_tile
    n_half = N // nsplit
    return pl.pallas_call(
        _stats_kernel_cm,
        out_shape=(jax.ShapeDtypeStruct((nsplit, C, 1), jnp.float32),
                   jax.ShapeDtypeStruct((nsplit, C, 1), jnp.float32)),
        grid=(nsplit, nc, n_half, nm),
        in_specs=[pl.BlockSpec((None, c_tile, m_tile),
                               lambda s, c, n, m: (s * n_half + n, c, m))],
        out_specs=(pl.BlockSpec((None, c_tile, 1), lambda s, c, n, m: (s, c, 0)),
                   pl.BlockSpec((None, c_tile, 1), lambda s, c, n, m: (s, c, 0))),
        compiler_params=pltpu.CompilerParams(
            dimension_semantics=("parallel", "parallel", "arbitrary", "arbitrary"),
            vmem_limit_bytes=vmem_limit),
    )(x3)


def _bn_apply_ncm(x3, sum_c, sumsq_c, gamma_c, beta_c, c_tile, m_tile,
                  inv_count, eps, vmem_limit):
    N, C, M = x3.shape
    nc, nm = C // c_tile, M // m_tile
    kern = functools.partial(_apply_kernel_cm, inv_count=inv_count, eps=eps)
    chan = pl.BlockSpec((c_tile, 1), lambda c, n, m: (c, 0))
    return pl.pallas_call(
        kern,
        out_shape=jax.ShapeDtypeStruct((N, C, M), x3.dtype),
        grid=(nc, N, nm),
        in_specs=[pl.BlockSpec((None, c_tile, m_tile), lambda c, n, m: (n, c, m)),
                  chan, chan, chan, chan],
        out_specs=pl.BlockSpec((None, c_tile, m_tile), lambda c, n, m: (n, c, m)),
        compiler_params=pltpu.CompilerParams(
            dimension_semantics=("parallel", "parallel", "parallel"),
            vmem_limit_bytes=vmem_limit),
    )(x3, sum_c, sumsq_c, gamma_c, beta_c)


# ---------------------------------------------------------------------------
# pallas_call wrappers -- fc path
# ---------------------------------------------------------------------------
def _bn_fused_nf(x2, gamma, beta, f_tile, inv_count, eps, vmem_limit):
    N, F = x2.shape
    nf = F // f_tile
    kern = functools.partial(_fused_kernel_nf, inv_count=inv_count, eps=eps)
    feat = pl.BlockSpec((1, f_tile), lambda f: (0, f))
    return pl.pallas_call(
        kern,
        out_shape=(jax.ShapeDtypeStruct((N, F), x2.dtype),
                   jax.ShapeDtypeStruct((1, F), jnp.float32),
                   jax.ShapeDtypeStruct((1, F), jnp.float32)),
        grid=(nf,),
        in_specs=[pl.BlockSpec((N, f_tile), lambda f: (0, f)), feat, feat],
        out_specs=(pl.BlockSpec((N, f_tile), lambda f: (0, f)), feat, feat),
        compiler_params=pltpu.CompilerParams(
            dimension_semantics=("parallel",), vmem_limit_bytes=vmem_limit),
    )(x2, gamma, beta)


def _bn_stats_nf(x2, n_tile, f_tile, nsplit, vmem_limit):
    N, F = x2.shape
    nf = F // f_tile
    nn = (N // nsplit) // n_tile
    return pl.pallas_call(
        _stats_kernel_nf,
        out_shape=(jax.ShapeDtypeStruct((nsplit, 1, F), jnp.float32),
                   jax.ShapeDtypeStruct((nsplit, 1, F), jnp.float32)),
        grid=(nsplit, nf, nn),
        in_specs=[pl.BlockSpec((n_tile, f_tile), lambda s, f, n: (s * nn + n, f))],
        out_specs=(pl.BlockSpec((None, 1, f_tile), lambda s, f, n: (s, 0, f)),
                   pl.BlockSpec((None, 1, f_tile), lambda s, f, n: (s, 0, f))),
        compiler_params=pltpu.CompilerParams(
            dimension_semantics=("parallel", "parallel", "arbitrary"),
            vmem_limit_bytes=vmem_limit),
    )(x2)


def _bn_apply_nf(x2, sum_f, sumsq_f, gamma, beta, n_tile, f_tile,
                 inv_count, eps, vmem_limit):
    N, F = x2.shape
    nn, nf = N // n_tile, F // f_tile
    kern = functools.partial(_apply_kernel_nf, inv_count=inv_count, eps=eps)
    feat = pl.BlockSpec((1, f_tile), lambda f, n: (0, f))
    return pl.pallas_call(
        kern,
        out_shape=jax.ShapeDtypeStruct((N, F), x2.dtype),
        grid=(nf, nn),
        in_specs=[pl.BlockSpec((n_tile, f_tile), lambda f, n: (n, f)),
                  feat, feat, feat, feat],
        out_specs=pl.BlockSpec((n_tile, f_tile), lambda f, n: (n, f)),
        compiler_params=pltpu.CompilerParams(
            dimension_semantics=("parallel", "parallel"),
            vmem_limit_bytes=vmem_limit),
    )(x2, sum_f, sumsq_f, gamma, beta)


# ---------------------------------------------------------------------------
# module wrapper
# ---------------------------------------------------------------------------
class BatchNorm:
    """JAX/Pallas port of the PyTorch BatchNorm module (training-mode forward
    runs on Pallas TPU kernels; eval mode is a trivial per-channel affine
    handled in plain JAX)."""

    def __init__(self, num_features, num_dims, eps=1e-05, momentum=0.9):
        assert num_dims in (2, 4)
        shape = (1, num_features) if num_dims == 2 else (1, num_features, 1, 1)
        self.shape = shape
        self.num_features = num_features
        self.num_dims = num_dims
        self.eps = eps
        self.momentum = momentum
        # Same init / running-stat convention as the reference (d2l-style)
        # module: gamma=1, beta=0, moving_mean=0, moving_var=0 and
        # moving = momentum*moving + (1-momentum)*batch  (NOT nn.BatchNorm2d's
        # convention -- intentional, matches the spec).
        self.gamma = jnp.ones(shape, dtype=jnp.float32)
        self.beta = jnp.zeros(shape, dtype=jnp.float32)
        self.moving_mean = jnp.zeros(shape, dtype=jnp.float32)
        self.moving_var = jnp.zeros(shape, dtype=jnp.float32)
        self.training = True
        self._block_elems = None   # test/tuning hook: override auto block sizing

    def __call__(self, x):
        C = self.num_features

        if not self.training:
            # Eval path: per-channel affine with the moving statistics (tiny
            # memory-bound elementwise op; plain JAX/XLA handles it fine).
            x_hat = (x - self.moving_mean) / jnp.sqrt(self.moving_var + self.eps)
            return self.gamma * x_hat + self.beta

        vmem_limit, block_elems = _hw_params()
        if self._block_elems is not None:
            block_elems = self._block_elems
        fused_elems = block_elems // 2      # fused path carries 2x in + 2x out buffers
        itemsize = jnp.dtype(x.dtype).itemsize

        if self.num_dims == 4:
            N, Cx, H, W = x.shape
            assert Cx == C
            M = H * W
            inv_count = 1.0 / float(N * M)
            x3 = x.reshape(N, C, M)                       # free, contiguous
            gamma_c = self.gamma.reshape(C, 1)
            beta_c = self.beta.reshape(C, 1)

            c_fused = _pick_fused_c_tile(N, C, M, itemsize, fused_elems)
            if c_fused is not None:
                # Single-pass, VMEM-resident: 2x HBM traffic, one launch.
                y3, mean_c, var_c = _bn_fused_ncm(
                    x3, gamma_c, beta_c, c_fused, inv_count, self.eps, vmem_limit)
            else:
                # Streaming two-pass path.
                c_tile, m_tile, nsplit = _pick_tiles_cm(N, C, M, itemsize, block_elems)
                s, s2 = _bn_stats_ncm(x3, c_tile, m_tile, nsplit, vmem_limit)
                sum_c = jnp.sum(s, axis=0)                # (C, 1) f32
                sumsq_c = jnp.sum(s2, axis=0)
                mean_c = sum_c * inv_count
                var_c = jnp.maximum(sumsq_c * inv_count - mean_c * mean_c, 0.0)
                y3 = _bn_apply_ncm(x3, sum_c, sumsq_c, gamma_c, beta_c,
                                   c_tile, m_tile, inv_count, self.eps, vmem_limit)
            y = y3.reshape(N, C, H, W)
            mean = mean_c.reshape(self.shape)
            var = var_c.reshape(self.shape)
        else:
            N, F = x.shape
            assert F == C
            inv_count = 1.0 / float(N)

            f_fused = _pick_fused_f_tile(N, F, itemsize, fused_elems)
            if f_fused is not None:
                y, mean, var = _bn_fused_nf(
                    x, self.gamma, self.beta, f_fused, inv_count, self.eps, vmem_limit)
            else:
                n_tile, f_tile, nsplit = _pick_tiles_nf(N, F, itemsize, block_elems)
                s, s2 = _bn_stats_nf(x, n_tile, f_tile, nsplit, vmem_limit)
                sum_f = jnp.sum(s, axis=0)                # (1, F) f32
                sumsq_f = jnp.sum(s2, axis=0)
                mean = sum_f * inv_count
                var = jnp.maximum(sumsq_f * inv_count - mean * mean, 0.0)
                y = _bn_apply_nf(x, sum_f, sumsq_f, self.gamma, self.beta,
                                 n_tile, f_tile, inv_count, self.eps, vmem_limit)

        # moving-stat update: same convention / momentum as the PyTorch module.
        self.moving_mean = self.momentum * self.moving_mean + (1 - self.momentum) * mean
        self.moving_var = self.momentum * self.moving_var + (1 - self.momentum) * var
        return y


# ---------------------------------------------------------------------------
# references + self-test
# ---------------------------------------------------------------------------
def _ref_bn_4d(x, gamma, beta, eps):
    mean = x.mean(axis=(0, 2, 3), keepdims=True)
    var = ((x - mean) ** 2).mean(axis=(0, 2, 3), keepdims=True)
    return gamma * (x - mean) / jnp.sqrt(var + eps) + beta


def _ref_bn_2d(x, gamma, beta, eps):
    mean = x.mean(axis=0, keepdims=True)
    var = ((x - mean) ** 2).mean(axis=0, keepdims=True)
    return gamma * (x - mean) / jnp.sqrt(var + eps) + beta


if __name__ == "__main__":
    key = jax.random.PRNGKey(0)
    k1, k2 = jax.random.split(key)

    # --- 4-D (conv) input, fused single-pass path ---
    N, C, H, W = 2, 4, 16, 16
    x = jax.random.normal(k1, (N, C, H, W), dtype=jnp.float32)
    bn = BatchNorm(num_features=C, num_dims=4)
    y = jax.block_until_ready(bn(x))
    y_ref = _ref_bn_4d(x, bn.gamma, bn.beta, bn.eps)
    assert y.shape == (N, C, H, W)
    assert jnp.allclose(y, y_ref, atol=1e-5, rtol=1e-5)

    # --- 4-D (conv) input, streaming two-pass path (forced via small budget,
    #     also exercises the batch-split partial-sum stats kernel) ---
    bn_tp = BatchNorm(num_features=C, num_dims=4)
    bn_tp._block_elems = 256
    y_tp = jax.block_until_ready(bn_tp(x))
    assert jnp.allclose(y_tp, y_ref, atol=1e-5, rtol=1e-5)

    # --- 2-D (fc) input, fused single-pass path ---
    N2, F = 16, 32
    x2 = jax.random.normal(k2, (N2, F), dtype=jnp.float32)
    bn2 = BatchNorm(num_features=F, num_dims=2)
    y2 = jax.block_until_ready(bn2(x2))
    y2_ref = _ref_bn_2d(x2, bn2.gamma, bn2.beta, bn2.eps)
    assert y2.shape == (N2, F)
    assert jnp.allclose(y2, y2_ref, atol=1e-5, rtol=1e-5)

    # --- 2-D (fc) input, streaming two-pass path (forced) ---
    bn2_tp = BatchNorm(num_features=F, num_dims=2)
    bn2_tp._block_elems = 64
    y2_tp = jax.block_until_ready(bn2_tp(x2))
    assert jnp.allclose(y2_tp, y2_ref, atol=1e-5, rtol=1e-5)

    print("KERNEL_OK")
</pallas_src>

<mosaic_0001>
module attributes {stable_mosaic.version = 11 : i64} {
  func.func @_fused_kernel_cm(%arg0: i32, %arg1: memref<2x4x256xf32, #tpu.memory_space<vmem>>, %arg2: memref<4x1xf32, #tpu.memory_space<vmem>>, %arg3: memref<4x1xf32, #tpu.memory_space<vmem>>, %arg4: memref<2x4x256xf32, #tpu.memory_space<vmem>>, %arg5: memref<4x1xf32, #tpu.memory_space<vmem>>, %arg6: memref<4x1xf32, #tpu.memory_space<vmem>>) attributes {dimension_semantics = [#tpu.dimension_semantics<parallel>], iteration_bounds = array<i64: 1>, scalar_prefetch = 0 : i64, scratch_operands = 0 : i64, tpu.core_type = #tpu.core_type<tc>, window_params = [{transform_indices = @transform_0, window_bounds = array<i64: 2, 4, 256>}, {transform_indices = @transform_1, window_bounds = array<i64: 4, 1>}, {transform_indices = @transform_2, window_bounds = array<i64: 4, 1>}, {transform_indices = @transform_3, window_bounds = array<i64: 2, 4, 256>}, {transform_indices = @transform_4, window_bounds = array<i64: 4, 1>}, {transform_indices = @transform_5, window_bounds = array<i64: 4, 1>}]} {
    %c0 = arith.constant 0 : index
    %c0_0 = arith.constant 0 : index
    %c0_1 = arith.constant 0 : index
    %0 = vector.load %arg1[%c0, %c0_0, %c0_1] : memref<2x4x256xf32, #tpu.memory_space<vmem>>, vector<2x4x256xf32>
    %cst = arith.constant dense<0.000000e+00> : vector<4x256xf32>
    %1 = vector.multi_reduction <add>, %0, %cst [0] : vector<2x4x256xf32> to vector<4x256xf32>
    %cst_2 = arith.constant dense<0.000000e+00> : vector<4xf32>
    %2 = vector.multi_reduction <add>, %1, %cst_2 [1] : vector<4x256xf32> to vector<4xf32>
    %3 = vector.shape_cast %2 : vector<4xf32> to vector<4x1xf32>
    %4 = arith.mulf %0, %0 : vector<2x4x256xf32>
    %cst_3 = arith.constant dense<0.000000e+00> : vector<4x256xf32>
    %5 = vector.multi_reduction <add>, %4, %cst_3 [0] : vector<2x4x256xf32> to vector<4x256xf32>
    %cst_4 = arith.constant dense<0.000000e+00> : vector<4xf32>
    %6 = vector.multi_reduction <add>, %5, %cst_4 [1] : vector<4x256xf32> to vector<4xf32>
    %7 = vector.shape_cast %6 : vector<4xf32> to vector<4x1xf32>
    %cst_5 = arith.constant 0.001953125 : f32
    %8 = vector.broadcast %cst_5 : f32 to vector<4x1xf32>
    %9 = arith.mulf %3, %8 : vector<4x1xf32>
    %cst_6 = arith.constant 0.001953125 : f32
    %10 = vector.broadcast %cst_6 : f32 to vector<4x1xf32>
    %11 = arith.mulf %7, %10 : vector<4x1xf32>
    %12 = arith.mulf %9, %9 : vector<4x1xf32>
    %13 = arith.subf %11, %12 : vector<4x1xf32>
    %cst_7 = arith.constant 0.000000e+00 : f32
    %14 = vector.broadcast %cst_7 : f32 to vector<4x1xf32>
    %15 = arith.maximumf %13, %14 : vector<4x1xf32>
    %c0_8 = arith.constant 0 : index
    %c0_9 = arith.constant 0 : index
    %16 = vector.load %arg2[%c0_8, %c0_9] : memref<4x1xf32, #tpu.memory_space<vmem>>, vector<4x1xf32>
    %cst_10 = arith.constant 9.99999974E-6 : f32
    %17 = vector.broadcast %cst_10 : f32 to vector<4x1xf32>
    %18 = arith.addf %15, %17 : vector<4x1xf32>
    %19 = math.rsqrt %18 : vector<4x1xf32>
    %20 = arith.mulf %16, %19 : vector<4x1xf32>
    %c0_11 = arith.constant 0 : index
    %c0_12 = arith.constant 0 : index
    %21 = vector.load %arg3[%c0_11, %c0_12] : memref<4x1xf32, #tpu.memory_space<vmem>>, vector<4x1xf32>
    %22 = arith.mulf %9, %20 : vector<4x1xf32>
    %23 = arith.subf %21, %22 : vector<4x1xf32>
    %24 = vector.shape_cast %20 : vector<4x1xf32> to vector<1x4x1xf32>
    %25 = vector.broadcast %24 : vector<1x4x1xf32> to vector<2x4x256xf32>
    %26 = arith.mulf %0, %25 : vector<2x4x256xf32>
    %27 = vector.shape_cast %23 : vector<4x1xf32> to vector<1x4x1xf32>
    %28 = vector.broadcast %27 : vector<1x4x1xf32> to vector<2x4x256xf32>
    %29 = arith.addf %26, %28 : vector<2x4x256xf32>
    %c0_13 = arith.constant 0 : index
    %c0_14 = arith.constant 0 : index
    %c0_15 = arith.constant 0 : index
    %30 = vector.load %arg4[%c0_13, %c0_14, %c0_15] : memref<2x4x256xf32, #tpu.memory_space<vmem>>, vector<2x4x256xf32>
    tpu.vector_store %arg4[%c0_13, %c0_14, %c0_15], %29 {strides = array<i32>} : memref<2x4x256xf32, #tpu.memory_space<vmem>>, vector<2x4x256xf32>,
    %c0_16 = arith.constant 0 : index
    %c0_17 = arith.constant 0 : index
    %31 = vector.load %arg5[%c0_16, %c0_17] : memref<4x1xf32, #tpu.memory_space<vmem>>, vector<4x1xf32>
    tpu.vector_store %arg5[%c0_16, %c0_17], %9 {strides = array<i32>} : memref<4x1xf32, #tpu.memory_space<vmem>>, vector<4x1xf32>,
    %c0_18 = arith.constant 0 : index
    %c0_19 = arith.constant 0 : index
    %32 = vector.load %arg6[%c0_18, %c0_19] : memref<4x1xf32, #tpu.memory_space<vmem>>, vector<4x1xf32>
    tpu.vector_store %arg6[%c0_18, %c0_19], %15 {strides = array<i32>} : memref<4x1xf32, #tpu.memory_space<vmem>>, vector<4x1xf32>,
    return
  }
  func.func @transform_0(%arg0: i32) -> (i32, i32, i32) {
    %c0_i32 = arith.constant 0 : i32
    %c0_i32_0 = arith.constant 0 : i32
    %c0_i32_1 = arith.constant 0 : i32
    return %c0_i32, %arg0, %c0_i32_0 : i32, i32, i32
  }
  func.func @transform_1(%arg0: i32) -> (i32, i32) {
    %c0_i32 = arith.constant 0 : i32
    %c0_i32_0 = arith.constant 0 : i32
    return %arg0, %c0_i32 : i32, i32
  }
  func.func @transform_2(%arg0: i32) -> (i32, i32) {
    %c0_i32 = arith.constant 0 : i32
    %c0_i32_0 = arith.constant 0 : i32
    return %arg0, %c0_i32 : i32, i32
  }
  func.func @transform_3(%arg0: i32) -> (i32, i32, i32) {
    %c0_i32 = arith.constant 0 : i32
    %c0_i32_0 = arith.constant 0 : i32
    %c0_i32_1 = arith.constant 0 : i32
    return %c0_i32, %arg0, %c0_i32_0 : i32, i32, i32
  }
  func.func @transform_4(%arg0: i32) -> (i32, i32) {
    %c0_i32 = arith.constant 0 : i32
    %c0_i32_0 = arith.constant 0 : i32
    return %arg0, %c0_i32 : i32, i32
  }
  func.func @transform_5(%arg0: i32) -> (i32, i32) {
    %c0_i32 = arith.constant 0 : i32
    %c0_i32_0 = arith.constant 0 : i32
    return %arg0, %c0_i32 : i32, i32
  }
}

</mosaic_0001>

<bundles_post_ra>
// kernel: tpu_custom_call.1
= control target key start
LH: loop header
LB: loop body
LE: loop exit
PB: predicated region body
PF: predicated region fallthrough
CT: control target
= control target key end

     0   :  { %11 = vsyncpa [#allocation3], 0  ;;  %s308_s0 = inlined_call_operand.hbm [shape: f32[2,4,256], index: 0, kind: input, shape index: {}]   ;;  %s309_s1 = inlined_call_operand.vmem [shape: f32[4,1], index: 1, kind: input, shape index: {}]   ;;  %s310_s2 = inlined_call_operand.vmem [shape: f32[4,1], index: 2, kind: input, shape index: {}]   ;;  %s311_s3 = inlined_call_operand.hbm [shape: f32[2,4,256], index: 3, kind: output, shape index: {0}]   ;;  %s312_s4 = inlined_call_operand.vmem [shape: f32[4,1], index: 4, kind: output, shape index: {1}]   ;;  %s313_s5 = inlined_call_operand.vmem [shape: f32[4,1], index: 5, kind: output, shape index: {2}]  }
   0x1   :  { %12 = vsyncpa [#allocation4], 0  ;;  %s17_s20 = sshll.u32 %s308_s0, 4  ;;  %s224_s21 = smov [#allocation2]   ;;  %s18_s20 = int_to_ptr.hbm [resolvable:$true] %s17_s20 }
   0x2   :  { %s19_s22 = sshll.u32 %s224_s21, 4  ;;  %s225_s23 = smov 128   ;;  %s20_s22 = int_to_ptr.vmem [resolvable:$true] %s19_s22 }
   0x3   :  { %s226_s24 = smov 8  }
   0x4   :  { %25 = dma.hbm_to_vmem [thread:$0]  %s18_s20, 256, %s20_s22, [#allocation3], %s225_s23, %s225_s23, %s226_s24  }
   0x5   :  { %220 = dma.done.wait [#allocation3], 256  }
   0x6   :  { %221 = vsyncadd [#allocation3], 4294967040  ;;  %v266_v0 = vld [vmem:[#allocation2] sm:$0xff]  ;;  %v268_v1 = vld [vmem:[#allocation2 + $0x8] sm:$0xff]  ;;  %vm49_vm0 = vcmask 1043456   ;;  %v227_v30 = vmov 0  }
   0x7   :  { %38 = vst [vmem:[#allocation1] ss:$2 sm:$0xff] %v266_v0  ;;  %v61_v2 = vmul.f32 %v266_v0, %v266_v0  ;;  %v62_v3 = vmul.f32 %v268_v1, %v268_v1  ;;  %168 = vset.pattern.permute.xlu1 %v227_v30  ;;  %169 = vset.pattern.permute.xlu0 %v227_v30  ;;  %vm132_vm1 = vcmask 3072   ;;  %v92_v44 = vld [vmem:[%s309_s1] sm:$0xf]  ;;  %s229_s1 = smov [#allocation5]  }
   0x8   :  { %42 = vst [vmem:[#allocation1 + $0x10] ss:$2 sm:$0xff] %v268_v1  ;;  %v105_v49 = vld [vmem:[%s310_s2] sm:$0xf]  ;;  %v228_v51 = vmov 839922192  }
   0x9   :  { %v113_v52 = vunpack.c.l.s4 %v228_v51  ;;  %s139_s30 = sshll.u32 %s229_s1, 4  ;;  %s141_s8 = sshll.u32 %s311_s3, 4  ;;  %s140_s30 = int_to_ptr.vmem [resolvable:$true] %s139_s30  ;;  %s142_s8 = int_to_ptr.hbm [resolvable:$true] %s141_s8 }
   0xb   :  { %v114_v54 = vunpack.c.0.s8 %v113_v52 }
   0xe   :  { %v39_v4 = vld.sshfl [vmem:[#allocation1] sm:$0xff pattern:$0x75316420]  ;;  %v40_v5 = vld.sshfl [vmem:[#allocation1 + $0x8] sm:$0xff pattern:$0x75316420] }
   0xf   :  { %v43_v6 = vld.sshfl [vmem:[#allocation1 + $0x10] sm:$0xff pattern:$0x75316420]  ;;  %v44_v7 = vld.sshfl [vmem:[#allocation1 + $0x18] sm:$0xff pattern:$0x75316420] }
  0x10   :  { %v50_v8 = vsel %vm49_vm0, %v39_v4, 0.0  ;;  %v51_v9 = vsel %vm49_vm0, %v43_v6, 0.0  ;;  %v53_v10 = vsel %vm49_vm0, %v40_v5, 0.0  ;;  %v54_v11 = vsel %vm49_vm0, %v44_v7, 0.0  ;;  %65 = vst [vmem:[#allocation1] ss:$2 sm:$0xff] %v61_v2 }
  0x11   :  { %v52_v12 = vadd.f32 %v51_v9, %v50_v8  ;;  %v55_v13 = vadd.f32 %v54_v11, %v53_v10  ;;  %69 = vst [vmem:[#allocation1 + $0x10] ss:$2 sm:$0xff] %v62_v3 }
  0x13   :  { %v56_v14 = vsel %vm49_vm0, %v52_v12, 0.0  ;;  %v57_v15 = vsel %vm49_vm0, %v55_v13, 0.0 }
  0x14   :  { %v58_v16 = vadd.f32 %v57_v15, %v56_v14 }
  0x16   :  { %59 = vadd.xlane.f32.xlu0 %v58_v16 }
  0x17   :  { %v66_v17 = vld.sshfl [vmem:[#allocation1] sm:$0xff pattern:$0x75316420]  ;;  %v67_v18 = vld.sshfl [vmem:[#allocation1 + $0x8] sm:$0xff pattern:$0x75316420] }
  0x18   :  { %v70_v19 = vld.sshfl [vmem:[#allocation1 + $0x10] sm:$0xff pattern:$0x75316420]  ;;  %v71_v20 = vld.sshfl [vmem:[#allocation1 + $0x18] sm:$0xff pattern:$0x75316420] }
  0x19   :  { %v76_v21 = vsel %vm49_vm0, %v66_v17, 0.0  ;;  %v77_v22 = vsel %vm49_vm0, %v70_v19, 0.0  ;;  %v79_v23 = vsel %vm49_vm0, %v67_v18, 0.0  ;;  %v80_v24 = vsel %vm49_vm0, %v71_v20, 0.0 }
  0x1a   :  { %v78_v25 = vadd.f32 %v77_v22, %v76_v21  ;;  %v81_v26 = vadd.f32 %v80_v24, %v79_v23 }
  0x1c   :  { %v82_v27 = vsel %vm49_vm0, %v78_v25, 0.0  ;;  %v83_v28 = vsel %vm49_vm0, %v81_v26, 0.0 }
  0x1d   :  { %v84_v29 = vadd.f32 %v83_v28, %v82_v27 }
  0x1f   :  { %85 = vadd.xlane.f32.xlu0 %v84_v29 }
  0x89   :  { %v60_v31 = vpop.xlane.xlu0 %59 }
  0x8a   :  { %v87_v32 = vmul.f32 0.001953125, %v60_v31 }
  0x8c   :  { %133 = vst.msk [vmem:[%s312_s4] sm:$0xf] %vm132_vm1, %v87_v32  ;;  %v89_v34 = vmul.f32 %v87_v32, %v87_v32 }
  0x92   :  { %v86_v33 = vpop.xlane.xlu0 %85 }
  0x93   :  { %v88_v35 = vmul.f32 0.001953125, %v86_v33 }
  0x95   :  { %v90_v36 = vsub.f32 %v88_v35, %v89_v34 }
  0x97   :  { %v91_v37 = vmax.f32 %v90_v36, 0.0 }
  0x99   :  { %v93_v38 = vadd.f32 1e-05, %v91_v37  ;;  %134 = vst.msk [vmem:[%s313_s5] sm:$0xf] %vm132_vm1, %v91_v37 }
  0x9b   :  { %170 = vrsqrt.f32 %v93_v38  ;;  %vm100_vm3 = vweird.f32 %v93_v38 }
  0xa1   :  { %v171_v39 = vpop.eup %170 }
  0xa2   :  { %v95_v40 = vmul.f32 %v171_v39, %v93_v38  ;;  %vm101_vm2 = vweird.f32 %v171_v39 }
  0xa3   :  { %vm102_vm4 = vmor %vm100_vm3, %vm101_vm2 }
  0xa4   :  { %v96_v41 = vmul.f32 %v171_v39, %v95_v40 }
  0xa6   :  { %v97_v42 = vmul.f32 0.5, %v96_v41 }
  0xa8   :  { %v98_v43 = vsub.f32 1.5, %v97_v42 }
  0xaa   :  { %v99_v45 = vmul.f32 %v171_v39, %v98_v43 }
  0xac   :  { %v103_v46 = vsel %vm102_vm4, %v171_v39, %v99_v45 }
  0xad   :  { %v104_v47 = vmul.f32 %v103_v46, %v92_v44 }
  0xaf   :  { %110 = vperm.xlu1 %168, %v104_v47   ;;  %v106_v48 = vmul.f32 %v104_v47, %v87_v32 }
  0xb1   :  { %v107_v50 = vsub.f32 %v105_v49, %v106_v48 }
  0xb7   :  { %121 = vperm.xlu1 %168, %v107_v50  }
 0x121   :  { %v111_v53 = vpop.permute.xlu1 %110 }
 0x122   :  { %v115_v55 = vperm.slane %v111_v53, %v114_v54 }
 0x124   :  { %v117_v57 = vmul.f32 %v115_v55, %v266_v0  ;;  %v118_v58 = vmul.f32 %v115_v55, %v268_v1 }
 0x129   :  { %v122_v56 = vpop.permute.xlu1 %121 }
 0x12a   :  { %v126_v59 = vperm.slane %v122_v56, %v114_v54 }
 0x12c   :  { %v128_v60 = vadd.f32 %v126_v59, %v117_v57  ;;  %v129_v61 = vadd.f32 %v126_v59, %v118_v58 }
 0x12e   :  { %130 = vst [vmem:[#allocation5] sm:$0xff] %v128_v60 }
 0x12f   :  { %131 = vst [vmem:[#allocation5 + $0x8] sm:$0xff] %v129_v61 }
 0x130   :  { %147 = dma.vmem_to_hbm [thread:$0]  %s140_s30, 256, %s142_s8, [#allocation4], %s225_s23, %s225_s23, %s226_s24  }
 0x131   :  { %222 = dma.done.wait [#allocation4], 256  }
 0x132   :  { %223 = vsyncadd [#allocation4], 4294967040 }
 0x133   :  { %160 = vsyncpa [#allocation3], 1 }
 0x134   :  { %161 = vsyncpa [#allocation4], 1 }

</bundles_post_ra>
